<compile_context>
chip_gen: v7x
topology: tpu7x:2x2x1
jax: 0.10.0
libtpu: 0.0.40
codegen_flags: <defaults>
</compile_context>

<pallas_src>
import functools

import jax
import jax.numpy as jnp
from jax import lax
from jax.experimental import pallas as pl
from jax.experimental.pallas import tpu as pltpu

_LANE = 128            # vreg lane width — fused output dim padded to this
_MAX_BATCH_BLOCK = 256 # per-grid-step batch tile (multiple of 8 sublanes)
_MAX_N_BLOCK = 512     # per-grid-step fused-output tile (multiple of 128 lanes)


def _fused_linear_relu_kernel(x_ref, w_ref, b_ref, o_ref):
    # x_ref: [block_b, in_f]      activations
    # w_ref: [block_n, in_f]      fused W1;W2 tile, PyTorch [out, in] layout
    # b_ref: [1, block_n]         fused b1;b2 tile
    # o_ref: [block_b, block_n]   relu(x @ W.T + b) tile
    y = lax.dot_general(
        x_ref[...], w_ref[...],
        dimension_numbers=(((1,), (1,)), ((), ())),  # contract x ax1 with w ax1
        preferred_element_type=jnp.float32,
    )
    y = y + b_ref[...]
    o_ref[...] = jnp.maximum(y, 0.0).astype(o_ref.dtype)


def prepare_params(w1, b1, w2, b2):
    """Fuse + lane-pad parameters (in a real model this is done ONCE at init).

    Returns (w_fused [n_pad, in_f], b_fused [1, n_pad], n_pad).
    """
    out_f, _ = w1.shape
    n = 2 * out_f
    n_pad = max(_LANE, pl.cdiv(n, _LANE) * _LANE)
    w = jnp.concatenate([w1, w2], axis=0)            # [2*out_f, in_f]
    b = jnp.concatenate([b1, b2], axis=0)            # [2*out_f]
    if n_pad > n:
        w = jnp.pad(w, ((0, n_pad - n), (0, 0)))
        b = jnp.pad(b, (0, n_pad - n))
    return w, b.reshape(1, n_pad), n_pad


@functools.partial(jax.jit, static_argnames=("out_dtype",))
def _fused_linear_relu(x, w_fused, b_fused, out_dtype=jnp.float32):
    B, in_f = x.shape
    n_pad, _ = w_fused.shape

    block_b = B if B <= _MAX_BATCH_BLOCK else _MAX_BATCH_BLOCK
    block_n = n_pad if n_pad <= _MAX_N_BLOCK else _MAX_N_BLOCK
    grid = (pl.cdiv(B, block_b), pl.cdiv(n_pad, block_n))

    grid_spec = pltpu.PrefetchScalarGridSpec(
        num_scalar_prefetch=0,
        grid=grid,
        in_specs=[
            pl.BlockSpec((block_b, in_f), lambda i, j: (i, 0)),
            pl.BlockSpec((block_n, in_f), lambda i, j: (j, 0)),
            pl.BlockSpec((1, block_n), lambda i, j: (0, j)),
        ],
        out_specs=pl.BlockSpec((block_b, block_n), lambda i, j: (i, j)),
    )

    itemsize = jnp.dtype(x.dtype).itemsize
    cost = pl.CostEstimate(
        flops=2 * B * in_f * n_pad,
        transcendentals=0,
        bytes_accessed=(B * in_f + n_pad * in_f + n_pad) * itemsize
        + B * n_pad * jnp.dtype(out_dtype).itemsize,
    )

    return pl.pallas_call(
        _fused_linear_relu_kernel,
        out_shape=jax.ShapeDtypeStruct((B, n_pad), out_dtype),
        grid_spec=grid_spec,
        cost_estimate=cost,
        compiler_params=pltpu.CompilerParams(
            # No reduction axis is split across the grid, so both axes are
            # independent; batch axis shards across v7x's 2 TensorCores.
            dimension_semantics=("parallel", "parallel")),
    )(x, w_fused, b_fused)


def affine_relu_mlp(x, w1, b1, w2, b2, *, compute_dtype=None):
    """x: [B, in_f]; w*: [out_f, in_f] (PyTorch layout); b*: [out_f].

    compute_dtype=jnp.bfloat16 casts x and the fused weight for the native MXU
    path (f32 accumulation is kept); None keeps full f32.
    """
    out_f = w1.shape[0]
    out_dtype = x.dtype

    # Parameter fusion/padding (done per call here; hoist to init in real use).
    w_fused, b_fused, _ = prepare_params(w1, b1, w2, b2)

    if compute_dtype is not None:
        x = x.astype(compute_dtype)
        w_fused = w_fused.astype(compute_dtype)

    fused = _fused_linear_relu(x, w_fused, b_fused, out_dtype=out_dtype)

    # Split the lane-dense fused output back into the two branches.
    log_s = fused[:, :out_f]
    t = fused[:, out_f:2 * out_f]
    return log_s, t


def reference(x, w1, b1, w2, b2):
    log_s = jnp.maximum(x @ w1.T + b1, 0.0)
    t = jnp.maximum(x @ w2.T + b2, 0.0)
    return log_s, t


if __name__ == "__main__":
    in_features = 32
    out_features = 32
    batch = 8

    key = jax.random.PRNGKey(0)
    kx, kw1, kb1, kw2, kb2 = jax.random.split(key, 5)

    # Deterministic parameter init (PyTorch Linear shapes: W [out, in], b [out]).
    bound = 1.0 / (in_features ** 0.5)
    x = jax.random.normal(kx, (batch, in_features), dtype=jnp.float32)
    w1 = jax.random.uniform(kw1, (out_features, in_features),
                            minval=-bound, maxval=bound, dtype=jnp.float32)
    b1 = jax.random.uniform(kb1, (out_features,),
                            minval=-bound, maxval=bound, dtype=jnp.float32)
    w2 = jax.random.uniform(kw2, (out_features, in_features),
                            minval=-bound, maxval=bound, dtype=jnp.float32)
    b2 = jax.random.uniform(kb2, (out_features,),
                            minval=-bound, maxval=bound, dtype=jnp.float32)

    log_s, t = affine_relu_mlp(x, w1, b1, w2, b2)
    jax.block_until_ready((log_s, t))

    log_s_ref, t_ref = reference(x, w1, b1, w2, b2)
    assert log_s.shape == log_s_ref.shape and t.shape == t_ref.shape
    assert jnp.allclose(log_s, log_s_ref, atol=1e-5, rtol=1e-5)
    assert jnp.allclose(t, t_ref, atol=1e-5, rtol=1e-5)

    print("KERNEL_OK")
</pallas_src>

<mosaic_0001>
module attributes {stable_mosaic.version = 11 : i64} {
  func.func @_fused_linear_relu_kernel(%arg0: i32, %arg1: i32, %arg2: memref<8x32xf32, #tpu.memory_space<vmem>>, %arg3: memref<128x32xf32, #tpu.memory_space<vmem>>, %arg4: memref<1x128xf32, #tpu.memory_space<vmem>>, %arg5: memref<8x128xf32, #tpu.memory_space<vmem>>) attributes {dimension_semantics = [#tpu.dimension_semantics<parallel>, #tpu.dimension_semantics<parallel>], iteration_bounds = array<i64: 1, 1>, scalar_prefetch = 0 : i64, scratch_operands = 0 : i64, tpu.core_type = #tpu.core_type<tc>, window_params = [{transform_indices = @transform_0, window_bounds = array<i64: 8, 32>}, {transform_indices = @transform_1, window_bounds = array<i64: 128, 32>}, {transform_indices = @transform_2, window_bounds = array<i64: 1, 128>}, {transform_indices = @transform_3, window_bounds = array<i64: 8, 128>}]} {
    %c0 = arith.constant 0 : index
    %c0_0 = arith.constant 0 : index
    %0 = vector.load %arg2[%c0, %c0_0] : memref<8x32xf32, #tpu.memory_space<vmem>>, vector<8x32xf32>
    %c0_1 = arith.constant 0 : index
    %c0_2 = arith.constant 0 : index
    %1 = vector.load %arg3[%c0_1, %c0_2] : memref<128x32xf32, #tpu.memory_space<vmem>>, vector<128x32xf32>
    %cst = arith.constant dense<0.000000e+00> : vector<8x128xf32>
    %2 = tpu.matmul %0, %1, %cst {dimension_numbers = #tpu.dot_dimension_numbers<[1], [1], [0], [0], [0, 0, 1, 0], [], []>} : vector<8x32xf32>, vector<128x32xf32>, vector<8x128xf32> -> vector<8x128xf32>
    %c0_3 = arith.constant 0 : index
    %c0_4 = arith.constant 0 : index
    %3 = vector.load %arg4[%c0_3, %c0_4] : memref<1x128xf32, #tpu.memory_space<vmem>>, vector<1x128xf32>
    %4 = vector.broadcast %3 : vector<1x128xf32> to vector<8x128xf32>
    %5 = arith.addf %2, %4 : vector<8x128xf32>
    %cst_5 = arith.constant 0.000000e+00 : f32
    %6 = vector.broadcast %cst_5 : f32 to vector<8x128xf32>
    %7 = arith.maximumf %5, %6 : vector<8x128xf32>
    %c0_6 = arith.constant 0 : index
    %c0_7 = arith.constant 0 : index
    %8 = vector.load %arg5[%c0_6, %c0_7] : memref<8x128xf32, #tpu.memory_space<vmem>>, vector<8x128xf32>
    tpu.vector_store %arg5[%c0_6, %c0_7], %7 {strides = array<i32>} : memref<8x128xf32, #tpu.memory_space<vmem>>, vector<8x128xf32>,
    return
  }
  func.func @transform_0(%arg0: i32, %arg1: i32) -> (i32, i32) {
    %c0_i32 = arith.constant 0 : i32
    %c0_i32_0 = arith.constant 0 : i32
    return %arg0, %c0_i32 : i32, i32
  }
  func.func @transform_1(%arg0: i32, %arg1: i32) -> (i32, i32) {
    %c0_i32 = arith.constant 0 : i32
    %c0_i32_0 = arith.constant 0 : i32
    return %arg1, %c0_i32 : i32, i32
  }
  func.func @transform_2(%arg0: i32, %arg1: i32) -> (i32, i32) {
    %c0_i32 = arith.constant 0 : i32
    %c0_i32_0 = arith.constant 0 : i32
    return %c0_i32, %arg1 : i32, i32
  }
  func.func @transform_3(%arg0: i32, %arg1: i32) -> (i32, i32) {
    %c0_i32 = arith.constant 0 : i32
    return %arg0, %arg1 : i32, i32
  }
}

</mosaic_0001>

<bundles_post_ra>
// kernel: _fused_linear_relu.1
= control target key start
LH: loop header
LB: loop body
LE: loop exit
PB: predicated region body
PF: predicated region fallthrough
CT: control target
= control target key end

     0   :  { %vm39_vm0 = vcmask 261120   ;;  %v307_v2 = vmov 0.0|0.0   ;;  %vm308_vm2 = vmmov 0   ;;  %v309_v5 = vmov 0.0   ;;  %s420_s0 = inlined_call_operand.vmem [shape: f32[8,32], index: 0, kind: input, shape index: {}]   ;;  %s421_s1 = inlined_call_operand.vmem [shape: f32[128,32], index: 1, kind: input, shape index: {}]   ;;  %s422_s2 = inlined_call_operand.vmem [shape: f32[1,128], index: 2, kind: input, shape index: {}]   ;;  %s423_s3 = inlined_call_operand.hbm [shape: f32[8,128], index: 3, kind: output, shape index: {}]  }
   0x1   :  { %v16_v0 = vld [vmem:[%s421_s1] sm:$0xff]  ;;  %v17_v1 = vld [vmem:[%s421_s1 + $0x8] sm:$0xff]  ;;  %247 = vmatprep.subr.bf16.mxu0 %v307_v2  ;;  %vm339_vm1 = vmpackc.low %vm39_vm0, %vm39_vm0  ;;  %244 = vmatprep.mubr.msk.f32.mxu0 %vm308_vm2, %v309_v5 }
   0x2   :  { %v248_v3 = vpack.c.bf16 %v17_v1, %v16_v0  ;;  %v18_v6 = vld [vmem:[%s421_s1 + $0x10] sm:$0xff]  ;;  %v19_v7 = vld [vmem:[%s421_s1 + $0x18] sm:$0xff] }
   0x4   :  { %250 = vmatpush3.bf16.xpose.msk.msra.mxu0 %vm339_vm1, %v248_v3 }
   0x5   :  { %251 = vmatprep.subr.bf16.mxu0 %v307_v2 }
   0x6   :  { %8 = vsyncpa [#allocation3], 0  ;;  %v252_v8 = vpack.c.bf16 %v19_v7, %v18_v6  ;;  %v20_v9 = vld [vmem:[%s421_s1 + $0x20] sm:$0xff]  ;;  %v21_v10 = vld [vmem:[%s421_s1 + $0x28] sm:$0xff]  ;;  %s310_s21 = smov [#allocation2]  }
   0x7   :  { %v256_v11 = vpack.c.bf16 %v21_v10, %v20_v9  ;;  %v22_v12 = vld [vmem:[%s421_s1 + $0x30] sm:$0xff]  ;;  %v23_v13 = vld [vmem:[%s421_s1 + $0x38] sm:$0xff]  ;;  %v24_v15 = vld [vmem:[%s421_s1 + $0x40] sm:$0xff]  ;;  %s169_s22 = sshll.u32 %s310_s21, 4  ;;  %s170_s22 = int_to_ptr.vmem [resolvable:$true] %s169_s22 }
   0x8   :  { %v260_v14 = vpack.c.bf16 %v23_v13, %v22_v12  ;;  %v25_v16 = vld [vmem:[%s421_s1 + $0x48] sm:$0xff]  ;;  %v26_v18 = vld [vmem:[%s421_s1 + $0x50] sm:$0xff]  ;;  %v27_v19 = vld [vmem:[%s421_s1 + $0x58] sm:$0xff]  ;;  %p288_p1 = scmp.lt.s32.totalorder %s170_s22, %s170_s22 }
   0x9   :  { %v264_v17 = vpack.c.bf16 %v25_v16, %v24_v15  ;;  %v268_v20 = vpack.c.bf16 %v27_v19, %v26_v18  ;;  %v28_v21 = vld [vmem:[%s421_s1 + $0x60] sm:$0xff]  ;;  %v29_v22 = vld [vmem:[%s421_s1 + $0x68] sm:$0xff]  ;;  %v30_v24 = vld [vmem:[%s421_s1 + $0x70] sm:$0xff] }
   0xa   :  { %v272_v23 = vpack.c.bf16 %v29_v22, %v28_v21  ;;  %v31_v25 = vld [vmem:[%s421_s1 + $0x78] sm:$0xff]  ;;  %v15_v27 = vld [vmem:[%s420_s0] sm:$0xff]  ;;  %s283_s1 = scalar_lea.vmem %s170_s22, 128 }
   0xb   :  { %v276_v26 = vpack.c.bf16 %v31_v25, %v30_v24  ;;  %v177_v28 = vld [vmem:[%s422_s2] ss:$0 sm:$0xff]  ;;  %p284_p0 = scmp.ne.s32.totalorder %s170_s22, %s283_s1  ;;  %p289_p2 = scmp.lt.s32.totalorder %s283_s1, %s283_s1 }
   0xc   :  { %254 = vmatpush3.bf16.xpose.msk.msra.mxu0 %vm339_vm1, %v252_v8 }
   0xd   :  { %255 = vmatprep.subr.bf16.mxu0 %v307_v2  ;;  %p290_p3 = por %p289_p2, %p288_p1 }
   0xf   :  { %p291_p4 = pnand %p290_p3, %p284_p0 }
  0x14   :  { %258 = vmatpush3.bf16.xpose.msk.msra.mxu0 %vm339_vm1, %v256_v11 }
  0x15   :  { %259 = vmatprep.subr.bf16.mxu0 %v307_v2 }
  0x1c   :  { %262 = vmatpush3.bf16.xpose.msk.msra.mxu0 %vm339_vm1, %v260_v14 }
  0x1d   :  { %263 = vmatprep.subr.bf16.mxu0 %v307_v2 }
  0x24   :  { %266 = vmatpush3.bf16.xpose.msk.msra.mxu0 %vm339_vm1, %v264_v17 }
  0x25   :  { %267 = vmatprep.subr.bf16.mxu0 %v307_v2 }
  0x2c   :  { %270 = vmatpush3.bf16.xpose.msk.msra.mxu0 %vm339_vm1, %v268_v20 }
  0x2d   :  { %271 = vmatprep.subr.bf16.mxu0 %v307_v2 }
  0x34   :  { %274 = vmatpush3.bf16.xpose.msk.msra.mxu0 %vm339_vm1, %v272_v23 }
  0x35   :  { %275 = vmatprep.subr.bf16.mxu0 %v307_v2 }
  0x3c   :  { %278 = vmatpush3.bf16.xpose.msk.msra.mxu0 %vm339_vm1, %v276_v26 }
  0x43   :  { %245 = vmatmul.mubr.msk.f32.vlgmr.msra.gmra.mrb[0].mxu0 %vm39_vm0, %v15_v27 }
 0x116   :  { %v157_v29 = vpop.f32.mrb[0].mxu0 }
 0x117   :  { %v158_v30 = vadd.f32 %v177_v28, %v157_v29  ;;  %v246_v31 = vpop.f32.mrb[1].mxu0 }
 0x119   :  { %v161_v32 = vmax.f32 %v158_v30, 0.0 }
 0x11b   :  { %162 = vst [vmem:[#allocation2] sm:$0xff] %v161_v32 }
 0x11c   :  { %294 = shalt.err (!%p291_p4)
}
 0x11d   :  { %s295_s24 = scalar_lea.hbm %s423_s3, 128 }
 0x11e   :  { %p296_p5 = scmp.ne.s32.totalorder %s423_s3, %s295_s24  ;;  %p299_p6 = scmp.lt.u32.totalorder %s295_s24, %s423_s3 }
 0x120   :  { %p301_p7 = pnand %p299_p6, %p296_p5 }
 0x122   :  { %304 = shalt.err (!%p301_p7)
}
 0x123   :  { %172 = dma.vmem_to_hbm [thread:$0]  %s170_s22, 128, %s423_s3, [#allocation3]  }
 0x124   :  { %305 = dma.done.wait [#allocation3], 128  }
 0x125   :  { %306 = vsyncadd [#allocation3], 4294967168 }
 0x126   :  { %176 = vsyncpa [#allocation3], 1 }

</bundles_post_ra>
